<compile_context>
chip_gen: v7x
topology: tpu7x:2x2x1
jax: 0.10.0
libtpu: 0.0.40
codegen_flags: <defaults>
</compile_context>

<pallas_src>
import math
import functools

import jax
import jax.numpy as jnp
import numpy as np
from jax.experimental import pallas as pl
from jax.experimental.pallas import tpu as pltpu


def _vmem_capacity_bytes():
    try:
        return int(pltpu.get_tpu_info().vmem_capacity_bytes)
    except Exception:
        return 64 << 20  # conservative default (v7x physical VMEM per core)


# --------------------------------------------------------------------------
# Path A: table resident in VMEM (small/medium vocab*d_model).
# --------------------------------------------------------------------------
def _embed_vmem_kernel(ids_ref, table_ref, out_ref, *, tb, slab, scale, vocab):
    # ids_ref  : (n_pad,) int32 in SMEM (scalar prefetch)
    # table_ref: (vocab, d_model) VMEM, resident across the grid
    # out_ref  : (tb, d_model) VMEM output block for this grid step
    base = pl.program_id(0) * tb

    def tok_at(idx):
        t = ids_ref[idx]
        return jnp.minimum(jnp.maximum(t, 0), vocab - 1)   # clamp: no OOB read

    n_slabs = tb // slab

    @pl.loop(0, n_slabs)
    def _gather(si):
        row0 = pl.multiple_of(si * slab, slab)
        for r in range(slab):                               # static unroll
            tok = tok_at(base + row0 + r)
            row = table_ref[pl.ds(tok, 1), :]               # in-VMEM dyn. load
            out_ref[pl.ds(row0 + r, 1), :] = (row * scale).astype(out_ref.dtype)


# --------------------------------------------------------------------------
# Path B: table in HBM, deep-ring DMA row gather directly into out_ref.
# --------------------------------------------------------------------------
def _embed_dma_kernel(ids_ref, table_ref, out_ref, sem_ref, *,
                      tb, nbuf, nsem, slab, scale, vocab):
    # ids_ref  : (n_pad,) int32 in SMEM (scalar prefetch)
    # table_ref: (vocab, d_model) in HBM (pl.ANY), gathered row by row via DMA
    # out_ref  : (tb, d_model) VMEM output block — DMAs land here directly
    # sem_ref  : (nsem,) DMA semaphores, nsem = 2*nbuf (start-before-wait ring)
    base = pl.program_id(0) * tb

    def tok_at(idx):
        t = ids_ref[idx]
        return jnp.minimum(jnp.maximum(t, 0), vocab - 1)   # clamp: no OOB DMA

    def start_row(t, tok):
        pltpu.make_async_copy(
            table_ref.at[pl.ds(tok, 1), :],
            out_ref.at[pl.ds(t, 1), :],
            sem_ref.at[t % nsem],
        ).start()

    def wait_row(t):
        # Wait only needs the semaphore + transfer size: static source slice,
        # so no SMEM id reload sits on the wait path.
        pltpu.make_async_copy(
            table_ref.at[pl.ds(0, 1), :],
            out_ref.at[pl.ds(t, 1), :],
            sem_ref.at[t % nsem],
        ).wait()

    # Prime the ring: nbuf row gathers in flight (fully unrolled).
    for t in range(nbuf):
        start_row(t, tok_at(base + t))

    n_slabs = tb // slab

    @pl.loop(0, n_slabs)
    def _drain(si):
        row0 = pl.multiple_of(si * slab, slab)
        for r in range(slab):                               # static unroll
            t = row0 + r
            refill = t + nbuf

            # Refill id is read and its DMA issued BEFORE the wait on row t
            # (2*nbuf semaphore slots keep the refill slot disjoint).
            @pl.when(refill < tb)
            def _():
                start_row(refill, tok_at(base + refill))

            wait_row(t)

        # Rows [row0, row0+slab) have landed: scale in place with a
        # sublane-aligned slab store while later row DMAs are still in flight.
        blk = out_ref[pl.ds(row0, slab), :]
        out_ref[pl.ds(row0, slab), :] = (blk * scale).astype(out_ref.dtype)


# --------------------------------------------------------------------------
# Wrapper
# --------------------------------------------------------------------------
def _pick_token_block(n, tb_max):
    """Token rows per grid step.

    Prefers blocks that (a) divide n exactly (no pad / post-slice), (b) are a
    multiple of 8 (sublane rule), and (c) leave >= 2 grid steps so the
    'parallel' axis can shard across v7x's two TensorCores.
    """
    cap = max(1, min(tb_max, n))
    # Pass 1: 8-aligned exact divisor leaving >= 2 grid steps.
    for d in range(min(cap, n // 2), 7, -1):
        if n % d == 0 and d % 8 == 0:
            return d
    # Pass 2: 8-aligned exact divisor (may give grid == 1).
    for d in range(cap, 7, -1):
        if n % d == 0 and d % 8 == 0:
            return d
    # Tiny n: one full block (block == full array dims is always legal).
    if n <= cap:
        return n
    # Fallback (e.g. large prime n): 8-aligned block + padding.
    return max(8, (cap // 8) * 8)


def embedder_forward(x, table, *, tb_max=512, nbuf=64, force_hbm_gather=False):
    """x: (B, S) int token ids; table: (vocab, d_model).

    Returns (B, S, d_model) = table[x] * sqrt(d_model).
    """
    B, S = x.shape
    vocab, d_model = table.shape
    scale = math.sqrt(d_model)
    itemsize = jnp.dtype(table.dtype).itemsize
    n = B * S

    vmem_cap = _vmem_capacity_bytes()

    # Cap tb so the double-buffered output blocks stay within ~1/4 of VMEM
    # (generation-aware: smaller on v7x, larger on v5e/v6e).
    out_budget = vmem_cap // 4
    tb_cap = max(8, (out_budget // (2 * d_model * itemsize)) // 8 * 8)
    tb = _pick_token_block(n, min(tb_max, tb_cap))
    n_pad = pl.cdiv(n, tb) * tb
    grid = (n_pad // tb,)

    ids = jnp.reshape(x, (n,)).astype(jnp.int32)
    if n_pad != n:
        # Padded tail tokens gather row 0; their rows are sliced off below.
        ids = jnp.pad(ids, (0, n_pad - n))

    # Sublane-aligned slab for the interleaved scale / unrolled gather.
    if itemsize <= 2 and tb % 16 == 0:
        slab = 16
    elif tb % 8 == 0:
        slab = 8
    else:
        slab = tb

    table_bytes = vocab * d_model * itemsize
    table_in_vmem = (not force_hbm_gather) and (table_bytes <= vmem_cap // 4)

    out_block_bytes = 2 * tb * d_model * itemsize       # double-buffered output
    if table_in_vmem:
        kernel = functools.partial(_embed_vmem_kernel, tb=tb, slab=slab,
                                   scale=scale, vocab=vocab)
        in_specs = [pl.BlockSpec((vocab, d_model), lambda i, ids: (0, 0))]
        scratch_shapes = []
        vmem_need = out_block_bytes + 2 * table_bytes
    else:
        nbuf = max(1, min(nbuf, tb))
        nsem = 2 * nbuf     # decoupled sem ring: refills start before waits
        kernel = functools.partial(_embed_dma_kernel, tb=tb, nbuf=nbuf,
                                   nsem=nsem, slab=slab, scale=scale,
                                   vocab=vocab)
        in_specs = [pl.BlockSpec(memory_space=pl.ANY)]  # table stays in HBM
        scratch_shapes = [pltpu.SemaphoreType.DMA((nsem,))]
        vmem_need = out_block_bytes

    vmem_limit = int(min(max(vmem_need + (8 << 20), 32 << 20),
                         max(vmem_cap - (8 << 20), 32 << 20)))

    out = pl.pallas_call(
        kernel,
        out_shape=jax.ShapeDtypeStruct((n_pad, d_model), table.dtype),
        grid_spec=pltpu.PrefetchScalarGridSpec(
            num_scalar_prefetch=1,                      # ids -> SMEM
            grid=grid,
            in_specs=in_specs,
            out_specs=pl.BlockSpec((tb, d_model), lambda i, ids: (i, 0)),
            scratch_shapes=scratch_shapes,
        ),
        compiler_params=pltpu.CompilerParams(
            dimension_semantics=("parallel",),
            vmem_limit_bytes=vmem_limit,
        ),
    )(ids, table)

    if n_pad != n:
        out = out[:n]
    # Row-major (n, d_model) -> (B, S, d_model) is a free metadata reshape.
    return jnp.reshape(out, (B, S, d_model))


if __name__ == "__main__":
    # Small shapes consistent with the module: batch=2, seq=8, vocab=64, d_model=32
    B, S, VOCAB, D_MODEL = 2, 8, 64, 32

    key = jax.random.PRNGKey(0)
    k_ids, k_table = jax.random.split(key)
    x = jax.random.randint(k_ids, (B, S), 0, VOCAB, dtype=jnp.int32)
    # nn.Embedding default init ~ N(0, 1)
    table = jax.random.normal(k_table, (VOCAB, D_MODEL), dtype=jnp.float32)

    ref = np.asarray(table)[np.asarray(x)] * math.sqrt(D_MODEL)

    # Default path (small table -> VMEM-resident gather).
    out = jax.block_until_ready(embedder_forward(x, table))
    assert out.shape == (B, S, D_MODEL)
    assert np.allclose(np.asarray(out), ref, rtol=1e-6, atol=1e-6)

    # Large-table path (HBM table, deep-ring DMA gather into the output block).
    out_hbm = jax.block_until_ready(
        embedder_forward(x, table, force_hbm_gather=True))
    assert np.allclose(np.asarray(out_hbm), ref, rtol=1e-6, atol=1e-6)

    print("KERNEL_OK")
</pallas_src>

<mosaic_0001>
module attributes {stable_mosaic.version = 11 : i64} {
  func.func @_embed_vmem_kernel(%arg0: i32, %arg1: memref<16xi32, #tpu.memory_space<smem>>, %arg2: memref<64x32xf32, #tpu.memory_space<vmem>>, %arg3: memref<8x32xf32, #tpu.memory_space<vmem>>) attributes {dimension_semantics = [#tpu.dimension_semantics<parallel>], iteration_bounds = array<i64: 2>, scalar_prefetch = 1 : i64, scratch_operands = 0 : i64, tpu.core_type = #tpu.core_type<tc>, window_params = [{pipeline_mode = #tpu.pipeline_mode<synchronous>, transform_indices = @transform_0, window_bounds = array<i64: 64, 32>}, {transform_indices = @transform_1, window_bounds = array<i64: 8, 32>}]} {
    %c8_i32 = arith.constant 8 : i32
    %0 = arith.muli %arg0, %c8_i32 : i32
    %c0_i32 = arith.constant 0 : i32
    %c1_i32 = arith.constant 1 : i32
    %1 = arith.muli %c0_i32, %c1_i32 : i32
    %c0_i32_0 = arith.constant 0 : i32
    %2 = arith.addi %c0_i32_0, %1 : i32
    %c8_i32_1 = arith.constant 8 : i32
    %3 = arith.muli %2, %c8_i32_1 : i32
    %4 = tpu.assume_multiple %3, 8 : i32
    %5 = arith.addi %0, %4 : i32
    %c0_i32_2 = arith.constant 0 : i32
    %6 = arith.addi %5, %c0_i32_2 : i32
    %7 = arith.index_cast %6 : i32 to index
    %8 = memref.load %arg1[%7] : memref<16xi32, #tpu.memory_space<smem>>
    %c0_i32_3 = arith.constant 0 : i32
    %9 = arith.maxsi %8, %c0_i32_3 : i32
    %c63_i32 = arith.constant 63 : i32
    %10 = arith.minsi %9, %c63_i32 : i32
    %11 = arith.index_cast %10 : i32 to index
    %c0 = arith.constant 0 : index
    %12 = vector.load %arg2[%11, %c0] : memref<64x32xf32, #tpu.memory_space<vmem>>, vector<1x32xf32>
    %cst = arith.constant 5.65685415 : f32
    %13 = vector.broadcast %cst : f32 to vector<1x32xf32>
    %14 = arith.mulf %12, %13 : vector<1x32xf32>
    %c0_i32_4 = arith.constant 0 : i32
    %15 = arith.addi %4, %c0_i32_4 : i32
    %16 = arith.index_cast %15 : i32 to index
    %c0_5 = arith.constant 0 : index
    %17 = vector.load %arg3[%16, %c0_5] : memref<8x32xf32, #tpu.memory_space<vmem>>, vector<1x32xf32>
    tpu.vector_store %arg3[%16, %c0_5], %14 {strides = array<i32>} : memref<8x32xf32, #tpu.memory_space<vmem>>, vector<1x32xf32>,
    %18 = arith.addi %0, %4 : i32
    %c1_i32_6 = arith.constant 1 : i32
    %19 = arith.addi %18, %c1_i32_6 : i32
    %20 = arith.index_cast %19 : i32 to index
    %21 = memref.load %arg1[%20] : memref<16xi32, #tpu.memory_space<smem>>
    %c0_i32_7 = arith.constant 0 : i32
    %22 = arith.maxsi %21, %c0_i32_7 : i32
    %c63_i32_8 = arith.constant 63 : i32
    %23 = arith.minsi %22, %c63_i32_8 : i32
    %24 = arith.index_cast %23 : i32 to index
    %c0_9 = arith.constant 0 : index
    %25 = vector.load %arg2[%24, %c0_9] : memref<64x32xf32, #tpu.memory_space<vmem>>, vector<1x32xf32>
    %cst_10 = arith.constant 5.65685415 : f32
    %26 = vector.broadcast %cst_10 : f32 to vector<1x32xf32>
    %27 = arith.mulf %25, %26 : vector<1x32xf32>
    %c1_i32_11 = arith.constant 1 : i32
    %28 = arith.addi %4, %c1_i32_11 : i32
    %29 = arith.index_cast %28 : i32 to index
    %c0_12 = arith.constant 0 : index
    %30 = vector.load %arg3[%29, %c0_12] : memref<8x32xf32, #tpu.memory_space<vmem>>, vector<1x32xf32>
    tpu.vector_store %arg3[%29, %c0_12], %27 {strides = array<i32>} : memref<8x32xf32, #tpu.memory_space<vmem>>, vector<1x32xf32>,
    %31 = arith.addi %0, %4 : i32
    %c2_i32 = arith.constant 2 : i32
    %32 = arith.addi %31, %c2_i32 : i32
    %33 = arith.index_cast %32 : i32 to index
    %34 = memref.load %arg1[%33] : memref<16xi32, #tpu.memory_space<smem>>
    %c0_i32_13 = arith.constant 0 : i32
    %35 = arith.maxsi %34, %c0_i32_13 : i32
    %c63_i32_14 = arith.constant 63 : i32
    %36 = arith.minsi %35, %c63_i32_14 : i32
    %37 = arith.index_cast %36 : i32 to index
    %c0_15 = arith.constant 0 : index
    %38 = vector.load %arg2[%37, %c0_15] : memref<64x32xf32, #tpu.memory_space<vmem>>, vector<1x32xf32>
    %cst_16 = arith.constant 5.65685415 : f32
    %39 = vector.broadcast %cst_16 : f32 to vector<1x32xf32>
    %40 = arith.mulf %38, %39 : vector<1x32xf32>
    %c2_i32_17 = arith.constant 2 : i32
    %41 = arith.addi %4, %c2_i32_17 : i32
    %42 = arith.index_cast %41 : i32 to index
    %c0_18 = arith.constant 0 : index
    %43 = vector.load %arg3[%42, %c0_18] : memref<8x32xf32, #tpu.memory_space<vmem>>, vector<1x32xf32>
    tpu.vector_store %arg3[%42, %c0_18], %40 {strides = array<i32>} : memref<8x32xf32, #tpu.memory_space<vmem>>, vector<1x32xf32>,
    %44 = arith.addi %0, %4 : i32
    %c3_i32 = arith.constant 3 : i32
    %45 = arith.addi %44, %c3_i32 : i32
    %46 = arith.index_cast %45 : i32 to index
    %47 = memref.load %arg1[%46] : memref<16xi32, #tpu.memory_space<smem>>
    %c0_i32_19 = arith.constant 0 : i32
    %48 = arith.maxsi %47, %c0_i32_19 : i32
    %c63_i32_20 = arith.constant 63 : i32
    %49 = arith.minsi %48, %c63_i32_20 : i32
    %50 = arith.index_cast %49 : i32 to index
    %c0_21 = arith.constant 0 : index
    %51 = vector.load %arg2[%50, %c0_21] : memref<64x32xf32, #tpu.memory_space<vmem>>, vector<1x32xf32>
    %cst_22 = arith.constant 5.65685415 : f32
    %52 = vector.broadcast %cst_22 : f32 to vector<1x32xf32>
    %53 = arith.mulf %51, %52 : vector<1x32xf32>
    %c3_i32_23 = arith.constant 3 : i32
    %54 = arith.addi %4, %c3_i32_23 : i32
    %55 = arith.index_cast %54 : i32 to index
    %c0_24 = arith.constant 0 : index
    %56 = vector.load %arg3[%55, %c0_24] : memref<8x32xf32, #tpu.memory_space<vmem>>, vector<1x32xf32>
    tpu.vector_store %arg3[%55, %c0_24], %53 {strides = array<i32>} : memref<8x32xf32, #tpu.memory_space<vmem>>, vector<1x32xf32>,
    %57 = arith.addi %0, %4 : i32
    %c4_i32 = arith.constant 4 : i32
    %58 = arith.addi %57, %c4_i32 : i32
    %59 = arith.index_cast %58 : i32 to index
    %60 = memref.load %arg1[%59] : memref<16xi32, #tpu.memory_space<smem>>
    %c0_i32_25 = arith.constant 0 : i32
    %61 = arith.maxsi %60, %c0_i32_25 : i32
    %c63_i32_26 = arith.constant 63 : i32
    %62 = arith.minsi %61, %c63_i32_26 : i32
    %63 = arith.index_cast %62 : i32 to index
    %c0_27 = arith.constant 0 : index
    %64 = vector.load %arg2[%63, %c0_27] : memref<64x32xf32, #tpu.memory_space<vmem>>, vector<1x32xf32>
    %cst_28 = arith.constant 5.65685415 : f32
    %65 = vector.broadcast %cst_28 : f32 to vector<1x32xf32>
    %66 = arith.mulf %64, %65 : vector<1x32xf32>
    %c4_i32_29 = arith.constant 4 : i32
    %67 = arith.addi %4, %c4_i32_29 : i32
    %68 = arith.index_cast %67 : i32 to index
    %c0_30 = arith.constant 0 : index
    %69 = vector.load %arg3[%68, %c0_30] : memref<8x32xf32, #tpu.memory_space<vmem>>, vector<1x32xf32>
    tpu.vector_store %arg3[%68, %c0_30], %66 {strides = array<i32>} : memref<8x32xf32, #tpu.memory_space<vmem>>, vector<1x32xf32>,
    %70 = arith.addi %0, %4 : i32
    %c5_i32 = arith.constant 5 : i32
    %71 = arith.addi %70, %c5_i32 : i32
    %72 = arith.index_cast %71 : i32 to index
    %73 = memref.load %arg1[%72] : memref<16xi32, #tpu.memory_space<smem>>
    %c0_i32_31 = arith.constant 0 : i32
    %74 = arith.maxsi %73, %c0_i32_31 : i32
    %c63_i32_32 = arith.constant 63 : i32
    %75 = arith.minsi %74, %c63_i32_32 : i32
    %76 = arith.index_cast %75 : i32 to index
    %c0_33 = arith.constant 0 : index
    %77 = vector.load %arg2[%76, %c0_33] : memref<64x32xf32, #tpu.memory_space<vmem>>, vector<1x32xf32>
    %cst_34 = arith.constant 5.65685415 : f32
    %78 = vector.broadcast %cst_34 : f32 to vector<1x32xf32>
    %79 = arith.mulf %77, %78 : vector<1x32xf32>
    %c5_i32_35 = arith.constant 5 : i32
    %80 = arith.addi %4, %c5_i32_35 : i32
    %81 = arith.index_cast %80 : i32 to index
    %c0_36 = arith.constant 0 : index
    %82 = vector.load %arg3[%81, %c0_36] : memref<8x32xf32, #tpu.memory_space<vmem>>, vector<1x32xf32>
    tpu.vector_store %arg3[%81, %c0_36], %79 {strides = array<i32>} : memref<8x32xf32, #tpu.memory_space<vmem>>, vector<1x32xf32>,
    %83 = arith.addi %0, %4 : i32
    %c6_i32 = arith.constant 6 : i32
    %84 = arith.addi %83, %c6_i32 : i32
    %85 = arith.index_cast %84 : i32 to index
    %86 = memref.load %arg1[%85] : memref<16xi32, #tpu.memory_space<smem>>
    %c0_i32_37 = arith.constant 0 : i32
    %87 = arith.maxsi %86, %c0_i32_37 : i32
    %c63_i32_38 = arith.constant 63 : i32
    %88 = arith.minsi %87, %c63_i32_38 : i32
    %89 = arith.index_cast %88 : i32 to index
    %c0_39 = arith.constant 0 : index
    %90 = vector.load %arg2[%89, %c0_39] : memref<64x32xf32, #tpu.memory_space<vmem>>, vector<1x32xf32>
    %cst_40 = arith.constant 5.65685415 : f32
    %91 = vector.broadcast %cst_40 : f32 to vector<1x32xf32>
    %92 = arith.mulf %90, %91 : vector<1x32xf32>
    %c6_i32_41 = arith.constant 6 : i32
    %93 = arith.addi %4, %c6_i32_41 : i32
    %94 = arith.index_cast %93 : i32 to index
    %c0_42 = arith.constant 0 : index
    %95 = vector.load %arg3[%94, %c0_42] : memref<8x32xf32, #tpu.memory_space<vmem>>, vector<1x32xf32>
    tpu.vector_store %arg3[%94, %c0_42], %92 {strides = array<i32>} : memref<8x32xf32, #tpu.memory_space<vmem>>, vector<1x32xf32>,
    %96 = arith.addi %0, %4 : i32
    %c7_i32 = arith.constant 7 : i32
    %97 = arith.addi %96, %c7_i32 : i32
    %98 = arith.index_cast %97 : i32 to index
    %99 = memref.load %arg1[%98] : memref<16xi32, #tpu.memory_space<smem>>
    %c0_i32_43 = arith.constant 0 : i32
    %100 = arith.maxsi %99, %c0_i32_43 : i32
    %c63_i32_44 = arith.constant 63 : i32
    %101 = arith.minsi %100, %c63_i32_44 : i32
    %102 = arith.index_cast %101 : i32 to index
    %c0_45 = arith.constant 0 : index
    %103 = vector.load %arg2[%102, %c0_45] : memref<64x32xf32, #tpu.memory_space<vmem>>, vector<1x32xf32>
    %cst_46 = arith.constant 5.65685415 : f32
    %104 = vector.broadcast %cst_46 : f32 to vector<1x32xf32>
    %105 = arith.mulf %103, %104 : vector<1x32xf32>
    %c7_i32_47 = arith.constant 7 : i32
    %106 = arith.addi %4, %c7_i32_47 : i32
    %107 = arith.index_cast %106 : i32 to index
    %c0_48 = arith.constant 0 : index
    %108 = vector.load %arg3[%107, %c0_48] : memref<8x32xf32, #tpu.memory_space<vmem>>, vector<1x32xf32>
    tpu.vector_store %arg3[%107, %c0_48], %105 {strides = array<i32>} : memref<8x32xf32, #tpu.memory_space<vmem>>, vector<1x32xf32>,
    %c1_i32_49 = arith.constant 1 : i32
    return
  }
  func.func @transform_0(%arg0: i32, %arg1: memref<16xi32, #tpu.memory_space<smem>>) -> (i32, i32) {
    %c0_i32 = arith.constant 0 : i32
    %c0_i32_0 = arith.constant 0 : i32
    %c0_i32_1 = arith.constant 0 : i32
    return %c0_i32, %c0_i32_0 : i32, i32
  }
  func.func @transform_1(%arg0: i32, %arg1: memref<16xi32, #tpu.memory_space<smem>>) -> (i32, i32) {
    %c0_i32 = arith.constant 0 : i32
    %c0_i32_0 = arith.constant 0 : i32
    return %arg0, %c0_i32 : i32, i32
  }
}

</mosaic_0001>

<bundles_post_ra>
// kernel: tpu_custom_call.1
= control target key start
LH: loop header
LB: loop body
LE: loop exit
PB: predicated region body
PF: predicated region fallthrough
CT: control target
= control target key end

     0   :  { %s656_s0 = inlined_call_operand.vmem [shape: s32[16], index: 0, kind: input, shape index: {}]   ;;  %s657_s1 = inlined_call_operand.vmem [shape: f32[64,32], index: 1, kind: input, shape index: {}]   ;;  %s658_s2 = inlined_call_operand.hbm [shape: f32[16,32], index: 2, kind: output, shape index: {}]  }
   0x1   :  { %s7_s11 = sshll.u32 %s656_s0, 4  ;;  %s8_s11 = int_to_ptr.vmem [resolvable:$true] %s7_s11 }
   0x2   :  { %s386_s12 = scalar_lea.vmem %s8_s11, 16  ;;  %p391_p1 = scmp.lt.s32.totalorder %s8_s11, %s8_s11 }
   0x3   :  { %p387_p0 = scmp.ne.s32.totalorder %s8_s11, %s386_s12  ;;  %p392_p2 = scmp.lt.s32.totalorder %s386_s12, %s386_s12 }
   0x5   :  { %p393_p3 = por %p392_p2, %p391_p1 }
   0x7   :  { %p394_p4 = pnand %p393_p3, %p387_p0 }
   0x9   :  { %397 = shalt.err (!%p394_p4)  }
   0xa   :  { %s464_s13 = smov [#allocation3]  }
   0xb   :  { %10 = dma.vmem_to_smem %s8_s11, 16, %s464_s13, [#allocation2] }
   0xc   :  { %442 = dma.done.wait [#allocation2], 16 }
   0xd   :  { %443 = vsyncadd [#allocation2], 4294967280 }
   0xe   :  { %12 = sfence }
   0xf   :  { %13 = vsyncpa [#allocation5], 0 }
  0x10   :  { %15 = vsyncpa [#allocation5 + $0x1], 0  ;;  %s484_s14 = smov 0   ;;  %s486_s15 = smov 0  }
  0x11   :  { %s488_s0 = smov 0   ;;  %s490_s16 = smov 0  }
  0x12 LB: > { %s505_s17 = sadd.s32 4294967295, %s462_s16   ;;  %s274_s18 = sadd.s32 4294967294, %s462_s16   ;;  %s462_s16 = sphi %s490_s16, %s664_s16   ;;  %s458_s0 = sphi %s488_s0, %s663_s0   ;;  %s454_s15 = sphi %s486_s15, %s662_s15   ;;  %s450_s14 = sphi %s484_s14, %s661_s14  }
  0x13   : > { %s509_s19 = sadd.s32 1, %s462_s16   ;;  %s49_s20 = sadd.s32 1, %s458_s0 }
  0x14   : > { %s46_s21 = ssub.s32 %s462_s16, %s509_s19  ;;  %p59_p5 = scmp.ne.s32.totalorder %s458_s0, %s454_s15 }
  0x15   : > { %p47_p6 = scmp.eq.s32.totalorder %s46_s21, 0  ;;  %p60_p7 = scmp.eq.s32.totalorder %s505_s17, 1 }
  0x16   : > { %p65_p8 = scmp.ne.s32.totalorder %s454_s15, %s450_s14  ;;  %p66_p9 = scmp.eq.s32.totalorder %s274_s18, 1 }
  0x17   : > { %s520_s22 = scalar_select %p47_p6, %s458_s0, %s49_s20  }
  0x18   : > { %p522_p10 = por %p60_p7, %p59_p5  ;;  %p526_p11 = por %p66_p9, %p65_p8 }
  0x19   : > { %p276_p12 = scmp.ge.s32.totalorder %s462_s16, 1  ;;  %p87_p13 = scmp.lt.s32.totalorder %s462_s16, 3 }
  0x1b   : > { %p88_p0 = pnand %p276_p12, %p87_p13 }
  0x1c   : > { %s99_s25 = sand.u32 (!%p88_p0), 1, %s454_s15   ;;  %s534_s26 = sshll.u32 (!%p88_p0), %s505_s17, 3  ;;  %vm112_vm0 = vcmask (!%p88_p0), 253952  }
  0x1d   : > { %91 = sbr.rel (%p88_p0) target bundleno = 84 (0x54), region = 24  ;;  %s277_s27 = sshll.u32 (!%p88_p0), %s99_s25, 3 }
  0x1e   : > { %s104_s28 = sld [smem:[#allocation3 + %s534_s26]] (!%p88_p0)  ;;  %s114_s29 = sadd.s32 (!%p88_p0), 1, %s534_s26 }
  0x1f   : > { %s126_s30 = sadd.s32 (!%p88_p0), 2, %s534_s26  ;;  %s115_s3 = sld [smem:[#allocation3 + %s114_s29]] (!%p88_p0) }
  0x20   : > { %s541_s4 = sld [smem:[#allocation3 + %s126_s30]] (!%p88_p0)  ;;  %s138_s5 = sadd.s32 (!%p88_p0), 3, %s534_s26 }
  0x21   : > { %s150_s6 = sadd.s32 (!%p88_p0), 4, %s534_s26  ;;  %s545_s7 = sld [smem:[#allocation3 + %s138_s5]] (!%p88_p0) }
  0x22   : > { %s547_s8 = sld [smem:[#allocation3 + %s150_s6]] (!%p88_p0)  ;;  %s162_s9 = sadd.s32 (!%p88_p0), 5, %s534_s26 }
  0x23   : > { %s174_s10 = sadd.s32 (!%p88_p0), 6, %s534_s26  ;;  %s560_s30 = scalar_lea.vmem (!%p88_p0), [#allocation4], %s277_s27 }
  0x24   : > { %p105_p1 = scmp.gt.s32.totalorder %s104_s28, 0  ;;  %p279_p2 = scmp.lt.s32.totalorder %s104_s28, 63 }
  0x25   : > { %p116_p3 = scmp.gt.s32.totalorder %s115_s3, 0  ;;  %p284_p4 = scmp.lt.s32.totalorder %s115_s3, 63 }
  0x26   : > { %s666_s28 = smov (!%p105_p1, %s104_s28), 0  ;;  %p128_p5 = scmp.gt.s32.totalorder %s541_s4, 0 }
  0x27   : > { %s668_s28 = smov (!%p279_p2, %s666_s28), 63  ;;  %s670_s3 = smov (!%p116_p3, %s115_s3), 0 }
  0x28   : > { %s109_s13 = scalar_lea.vmem %s657_s1, %s668_s28  ;;  %s672_s3 = smov (!%p284_p4, %s670_s3), 63 }
  0x29   : > { %v110_v0 = vld [vmem:[%s109_s13] sm:$0x1]  ;;  %s129_s18 = scalar_select %p128_p5, %s541_s4, 0 }
  0x2a   : > { %v111_v1 = vmul.f32 5.656854, %v110_v0  ;;  %s120_s29 = scalar_lea.vmem %s657_s1, %s672_s3  ;;  %p290_p6 = scmp.lt.s32.totalorder %s541_s4, 63 }
  0x2b   : > { %v121_v2 = vld [vmem:[%s120_s29] sm:$0x1]  ;;  %p140_p7 = scmp.gt.s32.totalorder %s545_s7, 0  ;;  %p296_p8 = scmp.lt.s32.totalorder %s545_s7, 63 }
  0x2c   : > { %113 = vst.msk [vmem:[%s560_s30] sm:$0x1] %vm112_vm0, %v111_v1  ;;  %v122_v3 = vmul.f32 5.656854, %v121_v2  ;;  %s674_s18 = smov (!%p290_p6, %s129_s18), 63  ;;  %p152_p9 = scmp.gt.s32.totalorder %s547_s8, 0 }
  0x2d   : > { %s676_s7 = smov (!%p140_p7, %s545_s7), 0  ;;  %s132_s3 = scalar_lea.vmem %s657_s1, %s674_s18 }
  0x2e   : > { %289 = vst.msk [vmem:[%s560_s30 + $0x1] sm:$0x1] %vm112_vm0, %v122_v3  ;;  %v133_v4 = vld [vmem:[%s132_s3] sm:$0x1]  ;;  %s678_s7 = smov (!%p296_p8, %s676_s7), 63  ;;  %p302_p12 = scmp.lt.s32.totalorder %s547_s8, 63 }
  0x2f   : > { %v134_v5 = vmul.f32 5.656854, %v133_v4  ;;  %s153_s4 = scalar_select %p152_p9, %s547_s8, 0 }
  0x30   : > { %s144_s11 = scalar_lea.vmem %s657_s1, %s678_s7  ;;  %s163_s12 = sld [smem:[#allocation3 + %s162_s9]] }
  0x31   : > { %295 = vst.msk [vmem:[%s560_s30 + $0x2] sm:$0x1] %vm112_vm0, %v134_v5  ;;  %v145_v6 = vld [vmem:[%s144_s11] sm:$0x1]  ;;  %s175_s13 = sld [smem:[#allocation3 + %s174_s10]]  ;;  %s680_s4 = smov (!%p302_p12, %s153_s4), 63 }
  0x32   : > { %v146_v7 = vmul.f32 5.656854, %v145_v6  ;;  %s186_s18 = sadd.s32 7, %s534_s26  ;;  %s156_s29 = scalar_lea.vmem %s657_s1, %s680_s4 }
  0x33   : > { %v157_v8 = vld [vmem:[%s156_s29] sm:$0x1]  ;;  %s187_s7 = sld [smem:[#allocation3 + %s186_s18]]  ;;  %s327_s3 = sshll.u32 %s505_s17, 7 }
  0x34   : > { %301 = vst.msk [vmem:[%s560_s30 + $0x3] sm:$0x1] %vm112_vm0, %v146_v7  ;;  %v158_v9 = vmul.f32 5.656854, %v157_v8  ;;  %s212_s4 = sshll.u32 %s560_s30, 4  ;;  %s610_s18 = scalar_lea.hbm %s658_s2, %s327_s3  ;;  %s612_s4 = int_to_ptr.vmem [resolvable:$true] %s212_s4 }
  0x35   : > { %s199_s17 = scalar_lea.sflag [#allocation5], %s99_s25  ;;  %s398_s20 = scalar_lea.vmem %s612_s4, 128 }
  0x36   : > { %p164_p13 = scmp.gt.s32.totalorder %s163_s12, 0  ;;  %p308_p0 = scmp.lt.s32.totalorder %s163_s12, 63  ;;  %307 = vst.msk [vmem:[%s560_s30 + $0x4] sm:$0x1] %vm112_vm0, %v158_v9 }
  0x37   : > { %p176_p1 = scmp.gt.s32.totalorder %s175_s13, 0  ;;  %p314_p2 = scmp.lt.s32.totalorder %s175_s13, 63 }
  0x38   : > { %s682_s12 = smov (!%p164_p13, %s163_s12), 0  ;;  %p399_p5 = scmp.ne.s32.totalorder %s612_s4, %s398_s20 }
  0x39   : > { %s684_s13 = smov (!%p176_p1, %s175_s13), 0  ;;  %s686_s12 = smov (!%p308_p0, %s682_s12), 63 }
  0x3a   : > { %s688_s13 = smov (!%p314_p2, %s684_s13), 63  ;;  %s168_s9 = scalar_lea.vmem %s657_s1, %s686_s12 }
  0x3b   : > { %p188_p3 = scmp.gt.s32.totalorder %s187_s7, 0  ;;  %v169_v10 = vld [vmem:[%s168_s9] sm:$0x1]  ;;  %s180_s27 = scalar_lea.vmem %s657_s1, %s688_s13 }
  0x3c   : > { %p320_p4 = scmp.lt.s32.totalorder %s187_s7, 63  ;;  %v170_v11 = vmul.f32 5.656854, %v169_v10  ;;  %v181_v12 = vld [vmem:[%s180_s27] sm:$0x1]  ;;  %p400_p6 = pnand %p399_p5, %p522_p10 }
  0x3d   : > { %s690_s7 = smov (!%p188_p3, %s187_s7), 0  ;;  %v182_v13 = vmul.f32 5.656854, %v181_v12  ;;  %s465_s21 = smov [#allocation4]  }
  0x3e   : > { %313 = vst.msk [vmem:[%s560_s30 + $0x5] sm:$0x1] %vm112_vm0, %v170_v11  ;;  %s692_s7 = smov (!%p320_p4, %s690_s7), 63  ;;  %p401_p7 = pneg %p400_p6 }
  0x3f   : > { %319 = vst.msk [vmem:[%s560_s30 + $0x6] sm:$0x1] %vm112_vm0, %v182_v13  ;;  %s192_s11 = scalar_lea.vmem %s657_s1, %s692_s7  ;;  %s402_s29 = sshll.u32 %s465_s21, 4  ;;  %s403_s29 = int_to_ptr.vmem [resolvable:$false] %s402_s29 }
  0x40   : > { %v193_v14 = vld [vmem:[%s192_s11] sm:$0x1]  ;;  %s404_s7 = scalar_lea.vmem %s403_s29, 256  ;;  %p405_p8 = scmp.lt.s32.totalorder %s612_s4, %s403_s29 }
  0x41   : > { %v194_v15 = vmul.f32 5.656854, %v193_v14  ;;  %p406_p9 = scmp.lt.s32.totalorder %s404_s7, %s398_s20 }
  0x43   : > { %325 = vst.msk [vmem:[%s560_s30 + $0x7] sm:$0x1] %vm112_vm0, %v194_v15  ;;  %p407_p12 = por %p406_p9, %p405_p8 }
  0x45   : > { %p408_p13 = pnand %p407_p12, %p401_p7 }
  0x47   : > { %411 = shalt.err (!%p408_p13)
}
  0x48   : > { %s412_s25 = scalar_lea.hbm %s610_s18, 128  ;;  %s416_s8 = scalar_lea.hbm %s658_s2, 256 }
  0x49   : > { %p413_p0 = scmp.ne.s32.totalorder %s610_s18, %s412_s25  ;;  %p417_p3 = scmp.lt.u32.totalorder %s610_s18, %s658_s2 }
  0x4a   : > { %p418_p4 = scmp.lt.u32.totalorder %s416_s8, %s412_s25  ;;  %p420_p6 = scmp.lt.u32.totalorder %s412_s25, %s610_s18 }
  0x4b   : > { %p414_p1 = pnand %p413_p0, %p522_p10 }
  0x4c   : > { %p419_p5 = por %p418_p4, %p417_p3 }
  0x4d   : > { %p415_p2 = pneg %p414_p1 }
  0x4e   : > { %p421_p7 = por %p420_p6, %p419_p5 }
  0x50   : > { %p422_p8 = pnand %p421_p7, %p415_p2 }
  0x52   : > { %425 = shalt.err (!%p422_p8)
}
  0x53   : > { %346 = dma.vmem_to_hbm [thread:$0]  (%p522_p10), %s612_s4, 128, %s610_s18, %s199_s17  }
  0x54 PF: > { %p352_p9 = scmp.ge.s32.totalorder %s462_s16, 2  ;;  %s224_s28 = sand.u32 1, %s450_s14  }
  0x55   : > { %s225_s27 = scalar_lea.sflag [#allocation5], %s224_s28 }
  0x56   : > { %p349_p12 = pnand %p352_p9, %p526_p11 }
  0x58   : > { %445 = dma.done.wait (!%p349_p12), %s225_s27, 128  }
  0x59   : > { %447 = vsyncadd (!%p349_p12), %s225_s27, 4294967168  ;;  %p18_p13 = scmp.ge.s32.totalorder %s509_s19, 4   ;;  %s661_s14 = smov %s454_s15 }
  0x5a   : > { %s662_s15 = smov %s458_s0  ;;  %s663_s0 = smov %s520_s22 }
  0x5b   : > { %s664_s16 = smov %s509_s19  ;;  %20 = sbr.rel (!%p18_p13) target bundleno = 18 (0x12), region = 71 }
  0x62   :  { %230 = vsyncpa [#allocation5], 1 }
  0x63   :  { %232 = vsyncpa [#allocation5 + $0x1], 1 }

</bundles_post_ra>
